<compile_context>
chip_gen: v6e
topology: v6e:2x2x1
jax: 0.10.0
libtpu: 0.0.40
codegen_flags: <defaults>
</compile_context>

<pallas_src>
import jax
import jax.numpy as jnp
from jax.experimental import pallas as pl
from jax.experimental.pallas import tpu as pltpu

_LANE = 128
_SUBLANE = 8


def _round_up(x, m):
    return (x + m - 1) // m * m


def _linear_sigmoid_kernel(x_ref, w_ref, b_ref, o_ref):
    # x_ref: (tb, P) VMEM block; w_ref: (P, k) VMEM (constant index -> resident);
    # b_ref: (1, 1) SMEM scalar; o_ref: (tb, k) VMEM block.
    z = jnp.dot(x_ref[...], w_ref[...], preferred_element_type=jnp.float32)
    z = z + b_ref[0, 0]
    # Exact sigmoid: exp on the EUP + one divide; fully hidden under the HBM DMA.
    o_ref[...] = (1.0 / (1.0 + jnp.exp(-z))).astype(o_ref.dtype)


def _per_buffer_budget_bytes():
    """Generation-aware budget for one (x row + out row) pipeline buffer."""
    try:
        cap = pltpu.get_tpu_info().vmem_capacity_bytes
    except Exception:
        cap = 64 * 1024 * 1024  # conservative (v7x per-TC VMEM)
    # ~1/8 of physical VMEM per buffer, capped at 12 MiB: double-buffer stays
    # <= ~16-24 MiB on v7x, ~24 MiB on v5e/v6e -- far past the ~2 MiB roofline knee.
    return int(max(2 * 1024 * 1024, min(cap // 8, 12 * 1024 * 1024)))


def _choose_tb(num_rows, in_cols, out_cols, itemsize):
    """Batch tile: multiple of 8, sized by bytes, >= 2 grid steps when possible."""
    if num_rows <= _SUBLANE:
        return num_rows  # single full-extent block
    per_buf = _per_buffer_budget_bytes()
    # One buffered row = lane-padded x row + lane-padded out row.
    row_bytes = (_round_up(in_cols, _LANE) + _round_up(out_cols, _LANE)) * itemsize
    tb = max(_SUBLANE, (per_buf // row_bytes) // _SUBLANE * _SUBLANE)
    # Keep at least 2 grid steps so the "parallel" axis feeds both v7x TensorCores.
    tb = min(tb, _round_up(pl.cdiv(num_rows, 2), _SUBLANE))
    return tb


def _vmem_limit_bytes(tb, in_cols, out_cols, itemsize):
    """Right-sized VMEM request: actual double-buffered allocation + slack."""
    x_blk = _round_up(max(tb, 1), _SUBLANE) * _round_up(in_cols, _LANE) * itemsize
    o_blk = _round_up(max(tb, 1), _SUBLANE) * _round_up(out_cols, _LANE) * itemsize
    w_blk = _round_up(in_cols, _SUBLANE) * _round_up(out_cols, _LANE) * itemsize
    total = 2 * (x_blk + o_blk + w_blk) + (2 << 20)  # double buffers + compiler slack
    return int(min(max(total, 4 << 20), 48 << 20))


def linear_sigmoid(x, w, b):
    """Pallas equivalent of torch.sigmoid(nn.Linear(D, 1)(x)).

    x: (B, D) float32
    w: (1, D) float32   (torch nn.Linear weight layout: (out=1, in=D))
    b: (1,) or (1, 1) float32
    returns: (B, 1) float32
    """
    B, D = x.shape
    assert w.shape == (1, D)
    b = jnp.asarray(b, x.dtype).reshape(1, 1)
    itemsize = jnp.dtype(x.dtype).itemsize

    # Lane-pack small D: fold k consecutive batch rows into one (k*D)-lane row.
    k = _LANE // D if D < _LANE else 1
    if k > 1 and B % k == 0:
        x_in = x.reshape(B // k, k * D)  # row-major relabeling, no data reordering
        # Block-diagonal weight: z[r, j] = x[r*k + j] . w  (one small MXU dot).
        w_in = jnp.kron(jnp.eye(k, dtype=x.dtype), jnp.transpose(w))  # (k*D, k)
    else:
        k = 1
        x_in = x
        w_in = jnp.transpose(w)  # (D, 1)

    rows, cols = x_in.shape
    tb = _choose_tb(rows, cols, k, itemsize)
    grid = (pl.cdiv(rows, tb),)  # ragged last block handled by Pallas, no padding

    out = pl.pallas_call(
        _linear_sigmoid_kernel,
        out_shape=jax.ShapeDtypeStruct((rows, k), x.dtype),
        grid=grid,
        in_specs=[
            pl.BlockSpec((tb, cols), lambda i: (i, 0)),              # x: batch-tiled
            pl.BlockSpec((cols, k), lambda i: (0, 0)),               # weight: resident
            pl.BlockSpec(memory_space=pltpu.MemorySpace.SMEM),       # bias: SMEM scalar
        ],
        out_specs=pl.BlockSpec((tb, k), lambda i: (i, 0)),
        compiler_params=pltpu.CompilerParams(
            dimension_semantics=("parallel",),                        # megacore on v7x
            vmem_limit_bytes=_vmem_limit_bytes(tb, cols, k, itemsize),
        ),
    )(x_in, w_in, b)

    # (rows, k) row-major flattens back to the original batch order.
    return out.reshape(B, 1)


def init_params(key, input_dim):
    """Deterministic init matching nn.Linear's default (uniform +-1/sqrt(D))."""
    kw, kb = jax.random.split(key)
    bound = 1.0 / jnp.sqrt(jnp.float32(input_dim))
    w = jax.random.uniform(kw, (1, input_dim), jnp.float32, -bound, bound)
    b = jax.random.uniform(kb, (1, 1), jnp.float32, -bound, bound)
    return w, b


if __name__ == "__main__":
    key = jax.random.PRNGKey(0)
    kx, kp = jax.random.split(key)

    # Small shapes consistent with the module: batch=200, input_dim=32.
    # Exercises the lane-pack path (k=4 -> 50 packed rows), a 2-step grid,
    # and a ragged last block (50 % 32 != 0) with no host-side padding.
    batch, input_dim = 200, 32
    x = jax.random.normal(kx, (batch, input_dim), jnp.float32)
    w, b = init_params(kp, input_dim)

    out = linear_sigmoid(x, w, b)
    out = jax.block_until_ready(out)

    # Reference: same math as the torch module.
    ref = jax.nn.sigmoid(x @ w.T + b[0, 0])
    assert out.shape == (batch, 1)
    assert jnp.allclose(out, ref, atol=2e-3, rtol=2e-3), "mismatch vs reference"

    print("KERNEL_OK")
</pallas_src>

<mosaic_0001>
module attributes {stable_mosaic.version = 11 : i64} {
  func.func @_linear_sigmoid_kernel(%arg0: i32, %arg1: memref<32x128xf32, #tpu.memory_space<vmem>>, %arg2: memref<128x4xf32, #tpu.memory_space<vmem>>, %arg3: memref<1x1xf32, #tpu.memory_space<smem>>, %arg4: memref<32x4xf32, #tpu.memory_space<vmem>>) attributes {dimension_semantics = [#tpu.dimension_semantics<parallel>], iteration_bounds = array<i64: 2>, scalar_prefetch = 0 : i64, scratch_operands = 0 : i64, tpu.core_type = #tpu.core_type<tc>, window_params = [{transform_indices = @transform_0, window_bounds = array<i64: 32, 128>}, {pipeline_mode = #tpu.pipeline_mode<synchronous>, transform_indices = @transform_1, window_bounds = array<i64: 128, 4>}, {transform_indices = @transform_2, window_bounds = array<i64: 1, 1>}, {transform_indices = @transform_3, window_bounds = array<i64: 32, 4>}]} {
    %c0 = arith.constant 0 : index
    %c0_0 = arith.constant 0 : index
    %0 = vector.load %arg1[%c0, %c0_0] : memref<32x128xf32, #tpu.memory_space<vmem>>, vector<32x128xf32>
    %c0_1 = arith.constant 0 : index
    %c0_2 = arith.constant 0 : index
    %1 = vector.load %arg2[%c0_1, %c0_2] : memref<128x4xf32, #tpu.memory_space<vmem>>, vector<128x4xf32>
    %cst = arith.constant dense<0.000000e+00> : vector<32x4xf32>
    %2 = tpu.matmul %0, %1, %cst {dimension_numbers = #tpu.dot_dimension_numbers<[1], [0], [0], [1], [0, 0, 1, 1], [], []>} : vector<32x128xf32>, vector<128x4xf32>, vector<32x4xf32> -> vector<32x4xf32>
    %c0_3 = arith.constant 0 : index
    %c0_4 = arith.constant 0 : index
    %3 = memref.load %arg3[%c0_3, %c0_4] : memref<1x1xf32, #tpu.memory_space<smem>>
    %4 = vector.broadcast %3 : f32 to vector<32x4xf32>
    %5 = arith.addf %2, %4 : vector<32x4xf32>
    %cst_5 = arith.constant 0.000000e+00 : f32
    %6 = vector.broadcast %cst_5 : f32 to vector<32x4xf32>
    %7 = arith.subf %6, %5 : vector<32x4xf32>
    %8 = math.exp %7 : vector<32x4xf32>
    %cst_6 = arith.constant 1.000000e+00 : f32
    %9 = vector.broadcast %cst_6 : f32 to vector<32x4xf32>
    %10 = arith.addf %9, %8 : vector<32x4xf32>
    %cst_7 = arith.constant 1.000000e+00 : f32
    %11 = vector.broadcast %cst_7 : f32 to vector<32x4xf32>
    %12 = arith.divf %11, %10 : vector<32x4xf32>
    %c0_8 = arith.constant 0 : index
    %c0_9 = arith.constant 0 : index
    %13 = vector.load %arg4[%c0_8, %c0_9] : memref<32x4xf32, #tpu.memory_space<vmem>>, vector<32x4xf32>
    tpu.vector_store %arg4[%c0_8, %c0_9], %12 {strides = array<i32>} : memref<32x4xf32, #tpu.memory_space<vmem>>, vector<32x4xf32>,
    return
  }
  func.func @transform_0(%arg0: i32) -> (i32, i32) {
    %c0_i32 = arith.constant 0 : i32
    %c0_i32_0 = arith.constant 0 : i32
    return %arg0, %c0_i32 : i32, i32
  }
  func.func @transform_1(%arg0: i32) -> (i32, i32) {
    %c0_i32 = arith.constant 0 : i32
    %c0_i32_0 = arith.constant 0 : i32
    %c0_i32_1 = arith.constant 0 : i32
    return %c0_i32, %c0_i32_0 : i32, i32
  }
  func.func @transform_2(%arg0: i32) -> (i32, i32) {
    %c0_i32 = arith.constant 0 : i32
    %c0_i32_0 = arith.constant 0 : i32
    %c0_i32_1 = arith.constant 0 : i32
    return %c0_i32, %c0_i32_0 : i32, i32
  }
  func.func @transform_3(%arg0: i32) -> (i32, i32) {
    %c0_i32 = arith.constant 0 : i32
    %c0_i32_0 = arith.constant 0 : i32
    return %arg0, %c0_i32 : i32, i32
  }
}

</mosaic_0001>

<bundles_post_ra>
// kernel: tpu_custom_call.1
= control target key start
LH: loop header
LB: loop body
LE: loop exit
PB: predicated region body
PF: predicated region fallthrough
CT: control target
= control target key end

     0   :  { %s1037_s0 = inlined_call_operand.vmem [shape: f32[50,128], index: 0, kind: input, shape index: {}]   ;;  %s1038_s1 = inlined_call_operand.vmem [shape: f32[128,4], index: 1, kind: input, shape index: {}]   ;;  %s1039_s2 = inlined_call_operand.<no memory space> [shape: f32[1,1], index: 2, kind: input, shape index: {}]   ;;  %s1040_s3 = inlined_call_operand.vmem [shape: f32[50,4], index: 3, kind: output, shape index: {}]  }
   0x1   :  { %8 = sst [smem:[#allocation2]] %s1039_s2 }
   0x2   :  { %s889_s14 = smov 0   ;;  %s891_s15 = smov 0  }
   0x3   :  { %s893_s16 = smov 0  }
   0x4 LB: > { %s902_s2 = sadd.s32 4294967295, %s832_s16   ;;  %s904_s17 = sadd.s32 1, %s832_s16   ;;  %s832_s16 = sphi %s893_s16, %s1047_s16   ;;  %s828_s15 = sphi %s891_s15, %s1046_s15   ;;  %s824_s14 = sphi %s889_s14, %s1045_s14  }
   0x5   : > { %s86_s18 = ssub.s32 %s832_s16, %s904_s17  ;;  %s89_s19 = sadd.s32 1, %s828_s15 }
   0x6   : > { %p87_p0 = scmp.eq.s32.totalorder %s86_s18, 0  ;;  %p99_p1 = scmp.ne.s32.totalorder %s828_s15, %s824_s14 }
   0x7   : > { %p100_p2 = scmp.eq.s32.totalorder %s902_s2, 1  ;;  %p560_p3 = scmp.ge.s32.totalorder %s832_s16, 1 }
   0x8   : > { %s912_s20 = scalar_select %p87_p0, %s828_s15, %s89_s19  }
   0x9   : > { %p914_p4 = por %p100_p2, %p99_p1  ;;  %p147_p5 = scmp.lt.s32.totalorder %s832_s16, 3 }
   0xb   : > { %p148_p6 = pnand %p560_p3, %p147_p5 }
   0xc   : > { %s943_s11 = sshll.u32 (!%p148_p6), %s902_s2, 2  ;;  %s213_s12 = sld [smem:[#allocation2]] (!%p148_p6) }
   0xd   : > { %151 = sbr.rel (%p148_p6) target bundleno = 324 (0x144), region = 32  ;;  %p179_p7 = scmp.lt.s32.totalorder (!%p148_p6), %s943_s11, 6 }
   0xe   : > { %s171_s13 = sand.u32 (!%p148_p6), 1, %s824_s14  }
   0xf   : > { %s561_s16 = sshll.u32 (!%p148_p6), %s171_s13, 5 }
  0x10   : > { %s975_s18 = scalar_lea.vmem (!%p148_p6), [#allocation3], %s561_s16  }
  0x12   : > { %v212_v0 = vld [vmem:[%s1038_s1 + $0x78] sm:$0xff]  ;;  %v211_v1 = vld [vmem:[%s1038_s1 + $0x70] sm:$0xff]  ;;  %v210_v2 = vld [vmem:[%s1038_s1 + $0x68] sm:$0xff]  ;;  %s180_s25 = scalar_select %p179_p7, %s943_s11, 6  ;;  %v214_v20 = vstv %s213_s12  ;;  %vm324_vm0 = vcmask 31744  }
  0x13   : > { %604 = vmatprep.subr.mxu0 %v212_v0  ;;  %642 = vmatprep.subr.mxu1 %v212_v0  ;;  %v209_v3 = vld [vmem:[%s1038_s1 + $0x60] sm:$0xff]  ;;  %v208_v4 = vld [vmem:[%s1038_s1 + $0x58] sm:$0xff]  ;;  %v207_v5 = vld [vmem:[%s1038_s1 + $0x50] sm:$0xff]  ;;  %s337_s14 = ssub.s32 (%p914_p4), 7, %s943_s11  ;;  %s581_s19 = sshll.u32 (%p914_p4), %s902_s2, 5 }
  0x14   : > { %605 = vmatpush3.msra.mxu0 %v212_v0  ;;  %658 = vmatpush3.msra.mxu1 %v212_v0  ;;  %v206_v6 = vld [vmem:[%s1038_s1 + $0x48] sm:$0xff]  ;;  %v205_v7 = vld [vmem:[%s1038_s1 + $0x40] sm:$0xff]  ;;  %v204_v8 = vld [vmem:[%s1038_s1 + $0x38] sm:$0xff]  ;;  %s563_s30 = sshll.u32 %s180_s25, 3  ;;  %p338_p8 = scmp.lt.s32.totalorder (%p914_p4), %s337_s14, 4 }
  0x15   : > { %606 = vmatprep.subr.mxu0 %v211_v1  ;;  %643 = vmatprep.subr.mxu1 %v211_v1  ;;  %v203_v9 = vld [vmem:[%s1038_s1 + $0x30] sm:$0xff]  ;;  %v202_v10 = vld [vmem:[%s1038_s1 + $0x28] sm:$0xff]  ;;  %v201_v11 = vld [vmem:[%s1038_s1 + $0x20] sm:$0xff]  ;;  %s182_s8 = scalar_lea.vmem %s1037_s0, %s563_s30  ;;  %s988_s24 = scalar_lea.vmem (%p914_p4), %s1040_s3, %s581_s19  }
  0x16   : > { %607 = vmatpush3.msra.mxu0 %v211_v1  ;;  %659 = vmatpush3.msra.mxu1 %v211_v1  ;;  %v200_v12 = vld [vmem:[%s1038_s1 + $0x18] sm:$0xff]  ;;  %v199_v13 = vld [vmem:[%s1038_s1 + $0x10] sm:$0xff]  ;;  %v198_v14 = vld [vmem:[%s1038_s1 + $0x8] sm:$0xff] }
  0x17   : > { %608 = vmatprep.subr.mxu0 %v210_v2  ;;  %644 = vmatprep.subr.mxu1 %v210_v2  ;;  %v197_v15 = vld [vmem:[%s1038_s1] sm:$0xff]  ;;  %v195_v17 = vld [vmem:[%s182_s8 + $0x10] sm:$0xff]  ;;  %v194_v18 = vld [vmem:[%s182_s8 + $0x8] sm:$0xff] }
  0x18   : > { %609 = vmatpush3.msra.mxu0 %v210_v2  ;;  %660 = vmatpush3.msra.mxu1 %v210_v2  ;;  %v193_v16 = vld [vmem:[%s182_s8] sm:$0xff]  ;;  %v196_v19 = vld [vmem:[%s182_s8 + $0x18] sm:$0xff] }
  0x19   : > { %610 = vmatprep.subr.mxu0 %v209_v3  ;;  %645 = vmatprep.subr.mxu1 %v209_v3 }
  0x1a   : > { %611 = vmatpush3.msra.mxu0 %v209_v3  ;;  %661 = vmatpush3.msra.mxu1 %v209_v3 }
  0x1b   : > { %612 = vmatprep.subr.mxu0 %v208_v4  ;;  %646 = vmatprep.subr.mxu1 %v208_v4 }
  0x1c   : > { %613 = vmatpush3.msra.mxu0 %v208_v4  ;;  %662 = vmatpush3.msra.mxu1 %v208_v4 }
  0x1d   : > { %614 = vmatprep.subr.mxu0 %v207_v5  ;;  %647 = vmatprep.subr.mxu1 %v207_v5 }
  0x1e   : > { %615 = vmatpush3.msra.mxu0 %v207_v5  ;;  %663 = vmatpush3.msra.mxu1 %v207_v5 }
  0x1f   : > { %616 = vmatprep.subr.mxu0 %v206_v6  ;;  %648 = vmatprep.subr.mxu1 %v206_v6 }
  0x20   : > { %617 = vmatpush3.msra.mxu0 %v206_v6  ;;  %664 = vmatpush3.msra.mxu1 %v206_v6 }
  0x21   : > { %618 = vmatprep.subr.mxu0 %v205_v7  ;;  %649 = vmatprep.subr.mxu1 %v205_v7 }
  0x22   : > { %619 = vmatpush3.msra.mxu0 %v205_v7  ;;  %665 = vmatpush3.msra.mxu1 %v205_v7 }
  0x23   : > { %620 = vmatprep.subr.mxu0 %v204_v8  ;;  %650 = vmatprep.subr.mxu1 %v204_v8 }
  0x24   : > { %621 = vmatpush3.msra.mxu0 %v204_v8  ;;  %666 = vmatpush3.msra.mxu1 %v204_v8 }
  0x25   : > { %622 = vmatprep.subr.mxu0 %v203_v9  ;;  %651 = vmatprep.subr.mxu1 %v203_v9 }
  0x26   : > { %623 = vmatpush3.msra.mxu0 %v203_v9  ;;  %667 = vmatpush3.msra.mxu1 %v203_v9 }
  0x27   : > { %624 = vmatprep.subr.mxu0 %v202_v10  ;;  %652 = vmatprep.subr.mxu1 %v202_v10 }
  0x28   : > { %625 = vmatpush3.msra.mxu0 %v202_v10  ;;  %668 = vmatpush3.msra.mxu1 %v202_v10 }
  0x29   : > { %626 = vmatprep.subr.mxu0 %v201_v11  ;;  %653 = vmatprep.subr.mxu1 %v201_v11 }
  0x2a   : > { %627 = vmatpush3.msra.mxu0 %v201_v11  ;;  %669 = vmatpush3.msra.mxu1 %v201_v11 }
  0x2b   : > { %628 = vmatprep.subr.mxu0 %v200_v12  ;;  %654 = vmatprep.subr.mxu1 %v200_v12 }
  0x2c   : > { %629 = vmatpush3.msra.mxu0 %v200_v12  ;;  %670 = vmatpush3.msra.mxu1 %v200_v12 }
  0x2d   : > { %630 = vmatprep.subr.mxu0 %v199_v13  ;;  %655 = vmatprep.subr.mxu1 %v199_v13 }
  0x2e   : > { %631 = vmatpush3.msra.mxu0 %v199_v13  ;;  %671 = vmatpush3.msra.mxu1 %v199_v13 }
  0x2f   : > { %632 = vmatprep.subr.mxu0 %v198_v14  ;;  %656 = vmatprep.subr.mxu1 %v198_v14 }
  0x30   : > { %633 = vmatpush3.msra.mxu0 %v198_v14  ;;  %672 = vmatpush3.msra.mxu1 %v198_v14 }
  0x31   : > { %634 = vmatprep.subr.mxu0 %v197_v15  ;;  %657 = vmatprep.subr.mxu1 %v197_v15 }
  0x32   : > { %635 = vmatpush3.msra.mxu0 %v197_v15  ;;  %673 = vmatpush3.msra.mxu1 %v197_v15 }
  0x33   : > { %636 = vmatprep.mubr.f32.mxu0 %v193_v16  ;;  %639 = vmatprep.mubr.f32.mxu1 %v195_v17 }
  0x34   : > { %637 = vmatmul.mubr.f32.vlgmr.msra.gmra.mxu0 %v194_v18  ;;  %640 = vmatmul.mubr.f32.vlgmr.msra.gmra.mxu1 %v196_v19 }
  0xf4   : > { %v638_v21 = vpop.f32.mrf.mxu0  ;;  %v641_v22 = vpop.f32.mrf.mxu1 }
  0xf5   : > { %v287_v23 = vadd.f32 %v638_v21, %v214_v20  ;;  %v297_v24 = vadd.f32 %v641_v22, %v214_v20 }
  0xf6   : > { %v281_v25 = vpop.f32.mrf.mxu0  ;;  %v291_v26 = vpop.f32.mrf.mxu1 }
  0xf7   : > { %v301_v27 = vsub.f32 0.0, %v287_v23  ;;  %v303_v28 = vsub.f32 0.0, %v297_v24  ;;  %v282_v29 = vadd.f32 %v281_v25, %v214_v20  ;;  %v292_v30 = vadd.f32 %v291_v26, %v214_v20 }
  0xf9   : > { %v306_v31 = vmul.f32 1.442695, %v301_v27  ;;  %v310_v32 = vmul.f32 1.442695, %v303_v28  ;;  %v300_v33 = vsub.f32 0.0, %v282_v29  ;;  %v302_v34 = vsub.f32 0.0, %v292_v30 }
  0xfb   : > { %762 = vpow2.f32 %v306_v31  ;;  %v304_v35 = vmul.f32 1.442695, %v300_v33  ;;  %v308_v36 = vmul.f32 1.442695, %v302_v34 }
  0xfc   : > { %764 = vpow2.f32 %v310_v32 }
  0xfd   : > { %766 = vpow2.f32 %v304_v35 }
  0xfe   : > { %768 = vpow2.f32 %v308_v36 }
 0x108   : > { %v763_v37 = vpop.eup %762 }
 0x109   : > { %v765_v38 = vpop.eup %764  ;;  %v313_v39 = vadd.f32 1.0, %v763_v37 }
 0x10a   : > { %v767_v40 = vpop.eup %766  ;;  %v315_v41 = vadd.f32 1.0, %v765_v38 }
 0x10b   : > { %v769_v42 = vpop.eup %768  ;;  %770 = vrcp.f32 %v313_v39  ;;  %v312_v43 = vadd.f32 1.0, %v767_v40 }
 0x10c   : > { %772 = vrcp.f32 %v315_v41  ;;  %v314_v44 = vadd.f32 1.0, %v769_v42 }
 0x10d   : > { %774 = vrcp.f32 %v312_v43 }
 0x10e   : > { %776 = vrcp.f32 %v314_v44 }
 0x118   : > { %v771_v45 = vpop.eup %770  ;;  %335 = sbr.rel (!%p914_p4) target bundleno = 324 (0x144), region = 36 }
 0x119   : > { %v773_v46 = vpop.eup %772  ;;  %326 = vst.msk [vmem:[%s975_s18 + $0x8] sm:$0xff] %vm324_vm0, %v771_v45 }
 0x11a   : > { %v775_v47 = vpop.eup %774  ;;  %328 = vst.msk [vmem:[%s975_s18 + $0x18] sm:$0xff] %vm324_vm0, %v773_v46 }
 0x11b   : > { %v777_v48 = vpop.eup %776  ;;  %325 = vst.msk [vmem:[%s975_s18] sm:$0xff] %vm324_vm0, %v775_v47 }
 0x11c   : > { %327 = vst.msk [vmem:[%s975_s18 + $0x10] sm:$0xff] %vm324_vm0, %v777_v48 }
 0x11d   : > { %s1049_s14 = smov (!%p338_p8, %s337_s14), 4 }
 0x11e   : > { %s566_s25 = sshll.u32 %s1049_s14, 7 }
 0x11f   : > { %p569_p9 = scmp.eq.s32.totalorder %s566_s25, 0 }
 0x120   : > { %s994_s26 = sshrl.u32 (!%p569_p9), %s1049_s14, 2 }
 0x121   : > { %346 = sbr.rel (%p569_p9) target bundleno = 324 (0x144), region = 40  ;;  %p570_p10 = scmp.le.s32.totalorder (!%p569_p9), %s994_s26, 0 }
 0x126   : > { %513 = sbr.rel (%p570_p10) target bundleno = 307 (0x133), region = 116  ;;  %s1042_s2 = smov (!%p570_p10), %s988_s24 }
 0x127   : > { %s1043_s21 = smov (!%p570_p10), %s975_s18  ;;  %s1003_s11 = smov (!%p570_p10), 0  }
 0x128   : > { %s846_s27 = smov (!%p570_p10), 0  }
 0x12b LB: >> { %v415_v49 = vld [vmem:[%s840_s21] sm:$0xff]  ;;  %v417_v50 = vld [vmem:[%s840_s21 + $0x8] sm:$0xff]  ;;  %v419_v51 = vld [vmem:[%s840_s21 + $0x10] sm:$0xff]  ;;  %s423_s28 = sadd.s32 1, %s844_s11  ;;  %s409_s27 = sadd.s32 1, %s848_s27   ;;  %s848_s27 = sphi %s846_s27, %s409_s27   ;;  %s844_s11 = sphi %s1003_s11, %s1044_s11   ;;  %s840_s21 = sphi %s1043_s21, %s428_s21   ;;  %s836_s2 = sphi %s1042_s2, %s429_s2  }
 0x12c   : >> { %416 = vst [vmem:[%s836_s2] sm:$0xff] %v415_v49  ;;  %418 = vst [vmem:[%s836_s2 + $0x8] sm:$0xff] %v417_v50  ;;  %v421_v52 = vld [vmem:[%s840_s21 + $0x18] sm:$0xff]  ;;  %p424_p11 = scmp.ge.s32.totalorder %s423_s28, %s994_s26  ;;  %p408_p12 = scmp.ge.s32.totalorder %s409_s27, %s994_s26 }
 0x12d   : >> { %420 = vst [vmem:[%s836_s2 + $0x10] sm:$0xff] %v419_v51  ;;  %422 = vst [vmem:[%s836_s2 + $0x18] sm:$0xff] %v421_v52 }
 0x12e   : >> { %s1051_s28 = smov (%p424_p11, %s423_s28), 0  ;;  %411 = sbr.rel (!%p408_p12) target bundleno = 299 (0x12b), region = 122 }
 0x12f   : >> { %s571_s29 = sshll.u32 %s1051_s28, 5  ;;  %s1044_s11 = smov %s1051_s28 }
 0x130   : >> { %s428_s21 = scalar_lea.vmem %s975_s18, %s571_s29 [#allocation3]   ;;  %s429_s2 = scalar_lea.vmem %s988_s24, %s571_s29  }
 0x133 PF: > { %s1019_s30 = sand.u32 3, %s1049_s14   ;;  %s582_s4 = sshll.u32 %s994_s26, 5 }
 0x134   : > { %s434_s5 = scalar_lea.vmem %s975_s18, %s582_s4 [#allocation3]   ;;  %s436_s6 = scalar_lea.vmem %s988_s24, %s582_s4  }
 0x135   : > { %p576_p13 = scmp.le.s32.totalorder %s1019_s30, 0 }
 0x136   : > { %s850_s7 = smov (!%p576_p13), %s436_s6   ;;  %s854_s8 = smov (!%p576_p13), %s434_s5  }
 0x137   : > { %527 = sbr.rel (%p576_p13) target bundleno = 324 (0x144), region = 127  ;;  %s858_s9 = smov (!%p576_p13), 0  }
 0x138   : > { %s862_s10 = smov (!%p576_p13), 0  }
 0x13c LB: >> { %v446_v53 = vld [vmem:[%s856_s8] sm:$0xff]  ;;  %s448_s12 = sadd.s32 1, %s860_s9  ;;  %s440_s10 = sadd.s32 1, %s864_s10   ;;  %s864_s10 = sphi %s862_s10, %s440_s10   ;;  %s860_s9 = sphi %s858_s9, %s859_s9   ;;  %s856_s8 = sphi %s854_s8, %s453_s8   ;;  %s852_s7 = sphi %s850_s7, %s454_s7  }
 0x13d   : >> { %447 = vst [vmem:[%s852_s7] sm:$0xff] %v446_v53  ;;  %p449_p0 = scmp.ge.s32.totalorder %s448_s12, %s1019_s30  ;;  %p439_p1 = scmp.ge.s32.totalorder %s440_s10, %s1019_s30 }
 0x13f   : >> { %s1053_s12 = smov (%p449_p0, %s448_s12), 0  ;;  %442 = sbr.rel (!%p439_p1) target bundleno = 316 (0x13c), region = 133 }
 0x140   : >> { %s577_s13 = sshll.u32 %s1053_s12, 3  ;;  %s859_s9 = smov %s1053_s12  }
 0x141   : >> { %s453_s8 = scalar_lea.vmem %s434_s5, %s577_s13 [#allocation3]   ;;  %s454_s7 = scalar_lea.vmem %s436_s6, %s577_s13  }
 0x144 PF: > { %p11_p2 = scmp.ge.s32.totalorder %s904_s17, 4   ;;  %s1045_s14 = smov %s828_s15 }
 0x145   : > { %s1046_s15 = smov %s912_s20  ;;  %s1047_s16 = smov %s904_s17 }
 0x146   :  { %13 = sbr.rel (!%p11_p2) target bundleno = 4 (0x4), region = 144 }

</bundles_post_ra>
